<compile_context>
chip_gen: v6e
topology: v6e:2x2x1
jax: 0.10.0
libtpu: 0.0.40
codegen_flags: <defaults>
</compile_context>

<pallas_src>
import jax
import jax.numpy as jnp
import numpy as np
from jax import lax
from jax.experimental import pallas as pl
from jax.experimental.pallas import tpu as pltpu

C_PAD = 128   # lane-dense padded class dimension for the head output
B_PAD = 8     # sublane-padded batch for the recurrent state (f32 min tile is (8,128))


# ----------------------------- fused kernel ----------------------------------
def fused_lstm_kernel(ids_ref, proj_ref, whh_ref, w1_ref, b1_ref,
                      w2p_ref, b2p_ref, o_ref, th_scr):
    TB = ids_ref.shape[0]            # T * B_PAD
    V = proj_ref.shape[0]            # vocab
    H = whh_ref.shape[0]             # hidden
    T, Bp, _ = th_scr.shape
    K1 = w1_ref.shape[1]             # hidden // 2
    B = w1_ref.shape[0] // H         # real batch (flatten width is B*H)

    # -- embedding gather + input projection + bias as ONE MXU matmul ---------
    # proj_ref = embed @ W_ih (gate-reordered) + b_lstm, so one_hot(ids) @ proj_ref
    # yields the input-side gate pre-activations for every (t, b) at once.
    ids = ids_ref[...]                                         # (T*Bp, 1) int32
    iota = lax.broadcasted_iota(jnp.int32, (TB, V), 1)
    one_hot = (iota == ids).astype(jnp.float32)                # (T*Bp, V)
    gx_all = jnp.dot(one_hot, proj_ref[...],
                     preferred_element_type=jnp.float32)       # (T*Bp, 4H)

    whh = whh_ref[...]                                         # (H, 4H), hoisted

    # -- fully unrolled recurrence: only h_prev @ W_hh on the serial chain ----
    h = jnp.zeros((Bp, H), jnp.float32)
    c = jnp.zeros((Bp, H), jnp.float32)
    for t in range(T):
        gates = gx_all[t * Bp:(t + 1) * Bp, :] + jnp.dot(
            h, whh, preferred_element_type=jnp.float32)        # (Bp, 4H) = one vreg
        # gate columns pre-ordered [i, f, o, g]:
        #   one sigmoid over a contiguous (Bp, 3H) slice + one tanh over (Bp, H)
        sig = jax.nn.sigmoid(gates[:, 0:3 * H])
        g_g = jnp.tanh(gates[:, 3 * H:4 * H])
        i_g = sig[:, 0:H]
        f_g = sig[:, H:2 * H]
        o_g = sig[:, 2 * H:3 * H]
        c = f_g * c + i_g * g_g
        h = o_g * jnp.tanh(c)
        th_scr[t] = jnp.tanh(h)        # module applies tanh(out); stored for the head

    # -- head: nn.Flatten(start_dim=1) expressed through a decomposed matmul --
    # x_flat[t] = [th[t,0,:], th[t,1,:], ...]  =>  h1 = sum_b th[:,b,:] @ W1[b*H:(b+1)*H]
    th_all = th_scr[...]                                       # (T, Bp, H)
    acc = jnp.zeros((T, K1), jnp.float32)
    for b in range(B):
        acc = acc + jnp.dot(th_all[:, b, :], w1_ref[b * H:(b + 1) * H, :],
                            preferred_element_type=jnp.float32)
    h1 = jnp.maximum(acc + b1_ref[...], 0.0)                   # Linear -> ReLU

    # output layer lane-padded to 128: padded W2 columns are exactly 0 and padded
    # bias is -1e30, so exp underflows to exactly 0 on padded lanes (f32 only).
    logits = jnp.dot(h1, w2p_ref[...],
                     preferred_element_type=jnp.float32) + b2p_ref[...]
    m = jnp.max(logits, axis=-1, keepdims=True)
    e = jnp.exp(logits - m)
    o_ref[...] = e / jnp.sum(e, axis=-1, keepdims=True)        # (T, 128) full-vreg store


def simple_lstm_forward(token_ids, kp, num_classes):
    T, B = token_ids.shape
    H = kp["whh"].shape[0]
    # pad batch to 8 sublanes; pad rows run through the recurrence (with token id 0,
    # a valid table row) but are never read by the head.
    ids_pad = jnp.zeros((T, B_PAD), jnp.int32).at[:, :B].set(token_ids)
    ids_flat = ids_pad.reshape(T * B_PAD, 1)

    vmem = pl.BlockSpec(memory_space=pltpu.MemorySpace.VMEM)
    out_padded = pl.pallas_call(
        fused_lstm_kernel,
        out_shape=jax.ShapeDtypeStruct((T, C_PAD), jnp.float32),
        in_specs=[vmem] * 7,
        out_specs=vmem,
        scratch_shapes=[pltpu.VMEM((T, B_PAD, H), jnp.float32)],
    )(ids_flat, kp["proj"], kp["whh"], kp["w1_t"], kp["b1"], kp["w2p"], kp["b2p"])
    return out_padded[:, :num_classes]


def prepare_kernel_params(params):
    """One-time repack: reorder gates, fold embedding+bias into the input
    projection table, lane-pad the output layer."""
    E, G4 = params["w_ih_t"].shape
    H = G4 // 4

    def reorder(w):  # PyTorch gate order [i, f, g, o] -> kernel order [i, f, o, g]
        return jnp.concatenate(
            [w[..., 0:H], w[..., H:2 * H], w[..., 3 * H:4 * H], w[..., 2 * H:3 * H]],
            axis=-1)

    w_ih_r = reorder(params["w_ih_t"])
    # Fold the (frozen) embedding AND the LSTM bias into one (vocab, 4H) table:
    # one-hot rows sum to exactly 1, so one_hot @ (embed @ W_ih + b) == embed[id] @ W_ih + b.
    proj = jnp.dot(params["embed"], w_ih_r,
                   precision=jax.lax.Precision.HIGHEST) + reorder(params["b_lstm"])

    K1, C = params["w2_t"].shape
    # Padded W2 columns MUST stay exactly zero and the padded bias very negative
    # so the full-128-lane softmax yields exactly 0 there (valid in f32 only).
    w2p = jnp.zeros((K1, C_PAD), jnp.float32).at[:, :C].set(params["w2_t"])
    b2p = jnp.full((1, C_PAD), -1e30, jnp.float32).at[:, :C].set(params["b2"])
    return {
        "proj": proj.astype(jnp.float32),
        "whh": reorder(params["w_hh_t"]).astype(jnp.float32),
        "w1_t": params["w1_t"],
        "b1": params["b1"],
        "w2p": w2p,
        "b2p": b2p,
    }


# ----------------------------- pure-JAX reference ----------------------------
def reference_forward(token_ids, params):
    x_emb = jnp.take(params["embed"], token_ids, axis=0)
    H = params["w_hh_t"].shape[0]

    def step(carry, x_t):
        h, c = carry
        gates = x_t @ params["w_ih_t"] + h @ params["w_hh_t"] + params["b_lstm"]
        i = jax.nn.sigmoid(gates[:, 0 * H:1 * H])
        f = jax.nn.sigmoid(gates[:, 1 * H:2 * H])
        g = jnp.tanh(gates[:, 2 * H:3 * H])
        o = jax.nn.sigmoid(gates[:, 3 * H:4 * H])
        c = f * c + i * g
        h = o * jnp.tanh(c)
        return (h, c), h

    B = token_ids.shape[1]
    h0 = jnp.zeros((B, H), jnp.float32)
    _, outs = lax.scan(step, (h0, h0), x_emb)
    x = jnp.tanh(outs).reshape(outs.shape[0], -1)
    x = jnp.maximum(x @ params["w1_t"] + params["b1"], 0.0)
    logits = x @ params["w2_t"] + params["b2"]
    return jax.nn.softmax(logits, axis=1)


# ----------------------------- main -------------------------------------------
if __name__ == "__main__":
    T, B = 8, 2                 # seq_len, batch
    vocab_size, E = 32, 16      # vocab, embedding_dim
    H, C = 32, 4                # hidden_dim, num_classes

    key = jax.random.PRNGKey(0)
    ks = jax.random.split(key, 10)

    def uniform(k, shape, scale):
        return jax.random.uniform(k, shape, jnp.float32, -scale, scale)

    s = 1.0 / np.sqrt(H)
    params = {
        "embed":  jax.random.normal(ks[0], (vocab_size, E), jnp.float32),
        # PyTorch stores W_ih (4H,E), W_hh (4H,H); pre-transposed for the kernel.
        "w_ih_t": uniform(ks[1], (E, 4 * H), s),
        "w_hh_t": uniform(ks[2], (H, 4 * H), s),
        "b_lstm": (uniform(ks[3], (1, 4 * H), s) + uniform(ks[4], (1, 4 * H), s)),  # b_ih + b_hh
        # fresh nn.Linear(B*H, H//2) created inside forward()
        "w1_t":   uniform(ks[5], (B * H, H // 2), 1.0 / np.sqrt(B * H)),
        "b1":     uniform(ks[6], (1, H // 2), 1.0 / np.sqrt(B * H)),
        # self.output_layer: Linear(H//2, C)
        "w2_t":   uniform(ks[7], (H // 2, C), 1.0 / np.sqrt(H // 2)),
        "b2":     uniform(ks[8], (1, C), 1.0 / np.sqrt(H // 2)),
    }

    token_ids = jax.random.randint(ks[9], (T, B), 0, vocab_size, dtype=jnp.int32)

    kparams = prepare_kernel_params(params)
    out = jax.block_until_ready(simple_lstm_forward(token_ids, kparams, C))
    ref = jax.block_until_ready(reference_forward(token_ids, params))

    assert out.shape == (T, C), out.shape
    np.testing.assert_allclose(np.asarray(out), np.asarray(ref), rtol=2e-5, atol=2e-5)
    print("KERNEL_OK")
</pallas_src>

<mosaic_0001>
module attributes {stable_mosaic.version = 11 : i64} {
  func.func @fused_lstm_kernel(%arg0: memref<64x1xi32, #tpu.memory_space<vmem>>, %arg1: memref<32x128xf32, #tpu.memory_space<vmem>>, %arg2: memref<32x128xf32, #tpu.memory_space<vmem>>, %arg3: memref<64x16xf32, #tpu.memory_space<vmem>>, %arg4: memref<1x16xf32, #tpu.memory_space<vmem>>, %arg5: memref<16x128xf32, #tpu.memory_space<vmem>>, %arg6: memref<1x128xf32, #tpu.memory_space<vmem>>, %arg7: memref<8x128xf32, #tpu.memory_space<vmem>>, %arg8: memref<8x8x32xf32, #tpu.memory_space<vmem>>) attributes {dimension_semantics = [], scalar_prefetch = 0 : i64, scratch_operands = 1 : i64, tpu.core_type = #tpu.core_type<tc>} {
    %c0 = arith.constant 0 : index
    %c0_0 = arith.constant 0 : index
    %0 = vector.load %arg0[%c0, %c0_0] : memref<64x1xi32, #tpu.memory_space<vmem>>, vector<64x1xi32>
    %1 = tpu.iota {dimensions = array<i32: 1>} : vector<64x32xi32>
    %2 = vector.broadcast %0 : vector<64x1xi32> to vector<64x32xi32>
    %3 = arith.cmpi eq, %1, %2 : vector<64x32xi32>
    %4 = arith.extui %3 : vector<64x32xi1> to vector<64x32xi32>
    %5 = arith.sitofp %4 : vector<64x32xi32> to vector<64x32xf32>
    %c0_1 = arith.constant 0 : index
    %c0_2 = arith.constant 0 : index
    %6 = vector.load %arg1[%c0_1, %c0_2] : memref<32x128xf32, #tpu.memory_space<vmem>>, vector<32x128xf32>
    %cst = arith.constant dense<0.000000e+00> : vector<64x128xf32>
    %7 = tpu.matmul %5, %6, %cst {dimension_numbers = #tpu.dot_dimension_numbers<[1], [0], [0], [1], [0, 0, 1, 1], [], []>} : vector<64x32xf32>, vector<32x128xf32>, vector<64x128xf32> -> vector<64x128xf32>
    %c0_3 = arith.constant 0 : index
    %c0_4 = arith.constant 0 : index
    %8 = vector.load %arg2[%c0_3, %c0_4] : memref<32x128xf32, #tpu.memory_space<vmem>>, vector<32x128xf32>
    %cst_5 = arith.constant 0.000000e+00 : f32
    %9 = vector.broadcast %cst_5 : f32 to vector<8x32xf32>
    %cst_6 = arith.constant 0.000000e+00 : f32
    %10 = vector.broadcast %cst_6 : f32 to vector<8x32xf32>
    %11 = vector.extract_strided_slice %7 {offsets = [0, 0], sizes = [8, 128], strides = [1, 1]} : vector<64x128xf32> to vector<8x128xf32>
    %cst_7 = arith.constant dense<0.000000e+00> : vector<8x128xf32>
    %12 = tpu.matmul %9, %8, %cst_7 {dimension_numbers = #tpu.dot_dimension_numbers<[1], [0], [0], [1], [0, 0, 1, 1], [], []>} : vector<8x32xf32>, vector<32x128xf32>, vector<8x128xf32> -> vector<8x128xf32>
    %13 = arith.addf %11, %12 : vector<8x128xf32>
    %14 = vector.extract_strided_slice %13 {offsets = [0, 0], sizes = [8, 96], strides = [1, 1]} : vector<8x128xf32> to vector<8x96xf32>
    %15 = arith.negf %14 : vector<8x96xf32>
    %16 = math.exp %15 : vector<8x96xf32>
    %cst_8 = arith.constant 1.000000e+00 : f32
    %17 = vector.broadcast %cst_8 : f32 to vector<8x96xf32>
    %18 = arith.addf %17, %16 : vector<8x96xf32>
    %19 = arith.divf %17, %18 : vector<8x96xf32>
    %20 = vector.extract_strided_slice %13 {offsets = [0, 96], sizes = [8, 32], strides = [1, 1]} : vector<8x128xf32> to vector<8x32xf32>
    %21 = math.tanh %20 : vector<8x32xf32>
    %22 = vector.extract_strided_slice %19 {offsets = [0, 0], sizes = [8, 32], strides = [1, 1]} : vector<8x96xf32> to vector<8x32xf32>
    %23 = vector.extract_strided_slice %19 {offsets = [0, 32], sizes = [8, 32], strides = [1, 1]} : vector<8x96xf32> to vector<8x32xf32>
    %24 = vector.extract_strided_slice %19 {offsets = [0, 64], sizes = [8, 32], strides = [1, 1]} : vector<8x96xf32> to vector<8x32xf32>
    %25 = arith.mulf %23, %10 : vector<8x32xf32>
    %26 = arith.mulf %22, %21 : vector<8x32xf32>
    %27 = arith.addf %25, %26 : vector<8x32xf32>
    %28 = math.tanh %27 : vector<8x32xf32>
    %29 = arith.mulf %24, %28 : vector<8x32xf32>
    %30 = math.tanh %29 : vector<8x32xf32>
    %c0_9 = arith.constant 0 : index
    %c0_10 = arith.constant 0 : index
    %c0_11 = arith.constant 0 : index
    %31 = vector.load %arg8[%c0_9, %c0_10, %c0_11] : memref<8x8x32xf32, #tpu.memory_space<vmem>>, vector<1x8x32xf32>
    %32 = vector.shape_cast %31 : vector<1x8x32xf32> to vector<8x32xf32>
    %33 = vector.shape_cast %30 : vector<8x32xf32> to vector<1x8x32xf32>
    tpu.vector_store %arg8[%c0_9, %c0_10, %c0_11], %33 {strides = array<i32>} : memref<8x8x32xf32, #tpu.memory_space<vmem>>, vector<1x8x32xf32>,
    %34 = vector.extract_strided_slice %7 {offsets = [8, 0], sizes = [8, 128], strides = [1, 1]} : vector<64x128xf32> to vector<8x128xf32>
    %cst_12 = arith.constant dense<0.000000e+00> : vector<8x128xf32>
    %35 = tpu.matmul %29, %8, %cst_12 {dimension_numbers = #tpu.dot_dimension_numbers<[1], [0], [0], [1], [0, 0, 1, 1], [], []>} : vector<8x32xf32>, vector<32x128xf32>, vector<8x128xf32> -> vector<8x128xf32>
    %36 = arith.addf %34, %35 : vector<8x128xf32>
    %37 = vector.extract_strided_slice %36 {offsets = [0, 0], sizes = [8, 96], strides = [1, 1]} : vector<8x128xf32> to vector<8x96xf32>
    %38 = arith.negf %37 : vector<8x96xf32>
    %39 = math.exp %38 : vector<8x96xf32>
    %cst_13 = arith.constant 1.000000e+00 : f32
    %40 = vector.broadcast %cst_13 : f32 to vector<8x96xf32>
    %41 = arith.addf %40, %39 : vector<8x96xf32>
    %42 = arith.divf %40, %41 : vector<8x96xf32>
    %43 = vector.extract_strided_slice %36 {offsets = [0, 96], sizes = [8, 32], strides = [1, 1]} : vector<8x128xf32> to vector<8x32xf32>
    %44 = math.tanh %43 : vector<8x32xf32>
    %45 = vector.extract_strided_slice %42 {offsets = [0, 0], sizes = [8, 32], strides = [1, 1]} : vector<8x96xf32> to vector<8x32xf32>
    %46 = vector.extract_strided_slice %42 {offsets = [0, 32], sizes = [8, 32], strides = [1, 1]} : vector<8x96xf32> to vector<8x32xf32>
    %47 = vector.extract_strided_slice %42 {offsets = [0, 64], sizes = [8, 32], strides = [1, 1]} : vector<8x96xf32> to vector<8x32xf32>
    %48 = arith.mulf %46, %27 : vector<8x32xf32>
    %49 = arith.mulf %45, %44 : vector<8x32xf32>
    %50 = arith.addf %48, %49 : vector<8x32xf32>
    %51 = math.tanh %50 : vector<8x32xf32>
    %52 = arith.mulf %47, %51 : vector<8x32xf32>
    %53 = math.tanh %52 : vector<8x32xf32>
    %c1 = arith.constant 1 : index
    %c0_14 = arith.constant 0 : index
    %c0_15 = arith.constant 0 : index
    %54 = vector.load %arg8[%c1, %c0_14, %c0_15] : memref<8x8x32xf32, #tpu.memory_space<vmem>>, vector<1x8x32xf32>
    %55 = vector.shape_cast %54 : vector<1x8x32xf32> to vector<8x32xf32>
    %56 = vector.shape_cast %53 : vector<8x32xf32> to vector<1x8x32xf32>
    tpu.vector_store %arg8[%c1, %c0_14, %c0_15], %56 {strides = array<i32>} : memref<8x8x32xf32, #tpu.memory_space<vmem>>, vector<1x8x32xf32>,
    %57 = vector.extract_strided_slice %7 {offsets = [16, 0], sizes = [8, 128], strides = [1, 1]} : vector<64x128xf32> to vector<8x128xf32>
    %cst_16 = arith.constant dense<0.000000e+00> : vector<8x128xf32>
    %58 = tpu.matmul %52, %8, %cst_16 {dimension_numbers = #tpu.dot_dimension_numbers<[1], [0], [0], [1], [0, 0, 1, 1], [], []>} : vector<8x32xf32>, vector<32x128xf32>, vector<8x128xf32> -> vector<8x128xf32>
    %59 = arith.addf %57, %58 : vector<8x128xf32>
    %60 = vector.extract_strided_slice %59 {offsets = [0, 0], sizes = [8, 96], strides = [1, 1]} : vector<8x128xf32> to vector<8x96xf32>
    %61 = arith.negf %60 : vector<8x96xf32>
    %62 = math.exp %61 : vector<8x96xf32>
    %cst_17 = arith.constant 1.000000e+00 : f32
    %63 = vector.broadcast %cst_17 : f32 to vector<8x96xf32>
    %64 = arith.addf %63, %62 : vector<8x96xf32>
    %65 = arith.divf %63, %64 : vector<8x96xf32>
    %66 = vector.extract_strided_slice %59 {offsets = [0, 96], sizes = [8, 32], strides = [1, 1]} : vector<8x128xf32> to vector<8x32xf32>
    %67 = math.tanh %66 : vector<8x32xf32>
    %68 = vector.extract_strided_slice %65 {offsets = [0, 0], sizes = [8, 32], strides = [1, 1]} : vector<8x96xf32> to vector<8x32xf32>
    %69 = vector.extract_strided_slice %65 {offsets = [0, 32], sizes = [8, 32], strides = [1, 1]} : vector<8x96xf32> to vector<8x32xf32>
    %70 = vector.extract_strided_slice %65 {offsets = [0, 64], sizes = [8, 32], strides = [1, 1]} : vector<8x96xf32> to vector<8x32xf32>
    %71 = arith.mulf %69, %50 : vector<8x32xf32>
    %72 = arith.mulf %68, %67 : vector<8x32xf32>
    %73 = arith.addf %71, %72 : vector<8x32xf32>
    %74 = math.tanh %73 : vector<8x32xf32>
    %75 = arith.mulf %70, %74 : vector<8x32xf32>
    %76 = math.tanh %75 : vector<8x32xf32>
    %c2 = arith.constant 2 : index
    %c0_18 = arith.constant 0 : index
    %c0_19 = arith.constant 0 : index
    %77 = vector.load %arg8[%c2, %c0_18, %c0_19] : memref<8x8x32xf32, #tpu.memory_space<vmem>>, vector<1x8x32xf32>
    %78 = vector.shape_cast %77 : vector<1x8x32xf32> to vector<8x32xf32>
    %79 = vector.shape_cast %76 : vector<8x32xf32> to vector<1x8x32xf32>
    tpu.vector_store %arg8[%c2, %c0_18, %c0_19], %79 {strides = array<i32>} : memref<8x8x32xf32, #tpu.memory_space<vmem>>, vector<1x8x32xf32>,
    %80 = vector.extract_strided_slice %7 {offsets = [24, 0], sizes = [8, 128], strides = [1, 1]} : vector<64x128xf32> to vector<8x128xf32>
    %cst_20 = arith.constant dense<0.000000e+00> : vector<8x128xf32>
    %81 = tpu.matmul %75, %8, %cst_20 {dimension_numbers = #tpu.dot_dimension_numbers<[1], [0], [0], [1], [0, 0, 1, 1], [], []>} : vector<8x32xf32>, vector<32x128xf32>, vector<8x128xf32> -> vector<8x128xf32>
    %82 = arith.addf %80, %81 : vector<8x128xf32>
    %83 = vector.extract_strided_slice %82 {offsets = [0, 0], sizes = [8, 96], strides = [1, 1]} : vector<8x128xf32> to vector<8x96xf32>
    %84 = arith.negf %83 : vector<8x96xf32>
    %85 = math.exp %84 : vector<8x96xf32>
    %cst_21 = arith.constant 1.000000e+00 : f32
    %86 = vector.broadcast %cst_21 : f32 to vector<8x96xf32>
    %87 = arith.addf %86, %85 : vector<8x96xf32>
    %88 = arith.divf %86, %87 : vector<8x96xf32>
    %89 = vector.extract_strided_slice %82 {offsets = [0, 96], sizes = [8, 32], strides = [1, 1]} : vector<8x128xf32> to vector<8x32xf32>
    %90 = math.tanh %89 : vector<8x32xf32>
    %91 = vector.extract_strided_slice %88 {offsets = [0, 0], sizes = [8, 32], strides = [1, 1]} : vector<8x96xf32> to vector<8x32xf32>
    %92 = vector.extract_strided_slice %88 {offsets = [0, 32], sizes = [8, 32], strides = [1, 1]} : vector<8x96xf32> to vector<8x32xf32>
    %93 = vector.extract_strided_slice %88 {offsets = [0, 64], sizes = [8, 32], strides = [1, 1]} : vector<8x96xf32> to vector<8x32xf32>
    %94 = arith.mulf %92, %73 : vector<8x32xf32>
    %95 = arith.mulf %91, %90 : vector<8x32xf32>
    %96 = arith.addf %94, %95 : vector<8x32xf32>
    %97 = math.tanh %96 : vector<8x32xf32>
    %98 = arith.mulf %93, %97 : vector<8x32xf32>
    %99 = math.tanh %98 : vector<8x32xf32>
    %c3 = arith.constant 3 : index
    %c0_22 = arith.constant 0 : index
    %c0_23 = arith.constant 0 : index
    %100 = vector.load %arg8[%c3, %c0_22, %c0_23] : memref<8x8x32xf32, #tpu.memory_space<vmem>>, vector<1x8x32xf32>
    %101 = vector.shape_cast %100 : vector<1x8x32xf32> to vector<8x32xf32>
    %102 = vector.shape_cast %99 : vector<8x32xf32> to vector<1x8x32xf32>
    tpu.vector_store %arg8[%c3, %c0_22, %c0_23], %102 {strides = array<i32>} : memref<8x8x32xf32, #tpu.memory_space<vmem>>, vector<1x8x32xf32>,
    %103 = vector.extract_strided_slice %7 {offsets = [32, 0], sizes = [8, 128], strides = [1, 1]} : vector<64x128xf32> to vector<8x128xf32>
    %cst_24 = arith.constant dense<0.000000e+00> : vector<8x128xf32>
    %104 = tpu.matmul %98, %8, %cst_24 {dimension_numbers = #tpu.dot_dimension_numbers<[1], [0], [0], [1], [0, 0, 1, 1], [], []>} : vector<8x32xf32>, vector<32x128xf32>, vector<8x128xf32> -> vector<8x128xf32>
    %105 = arith.addf %103, %104 : vector<8x128xf32>
    %106 = vector.extract_strided_slice %105 {offsets = [0, 0], sizes = [8, 96], strides = [1, 1]} : vector<8x128xf32> to vector<8x96xf32>
    %107 = arith.negf %106 : vector<8x96xf32>
    %108 = math.exp %107 : vector<8x96xf32>
    %cst_25 = arith.constant 1.000000e+00 : f32
    %109 = vector.broadcast %cst_25 : f32 to vector<8x96xf32>
    %110 = arith.addf %109, %108 : vector<8x96xf32>
    %111 = arith.divf %109, %110 : vector<8x96xf32>
    %112 = vector.extract_strided_slice %105 {offsets = [0, 96], sizes = [8, 32], strides = [1, 1]} : vector<8x128xf32> to vector<8x32xf32>
    %113 = math.tanh %112 : vector<8x32xf32>
    %114 = vector.extract_strided_slice %111 {offsets = [0, 0], sizes = [8, 32], strides = [1, 1]} : vector<8x96xf32> to vector<8x32xf32>
    %115 = vector.extract_strided_slice %111 {offsets = [0, 32], sizes = [8, 32], strides = [1, 1]} : vector<8x96xf32> to vector<8x32xf32>
    %116 = vector.extract_strided_slice %111 {offsets = [0, 64], sizes = [8, 32], strides = [1, 1]} : vector<8x96xf32> to vector<8x32xf32>
    %117 = arith.mulf %115, %96 : vector<8x32xf32>
    %118 = arith.mulf %114, %113 : vector<8x32xf32>
    %119 = arith.addf %117, %118 : vector<8x32xf32>
    %120 = math.tanh %119 : vector<8x32xf32>
    %121 = arith.mulf %116, %120 : vector<8x32xf32>
    %122 = math.tanh %121 : vector<8x32xf32>
    %c4 = arith.constant 4 : index
    %c0_26 = arith.constant 0 : index
    %c0_27 = arith.constant 0 : index
    %123 = vector.load %arg8[%c4, %c0_26, %c0_27] : memref<8x8x32xf32, #tpu.memory_space<vmem>>, vector<1x8x32xf32>
    %124 = vector.shape_cast %123 : vector<1x8x32xf32> to vector<8x32xf32>
    %125 = vector.shape_cast %122 : vector<8x32xf32> to vector<1x8x32xf32>
    tpu.vector_store %arg8[%c4, %c0_26, %c0_27], %125 {strides = array<i32>} : memref<8x8x32xf32, #tpu.memory_space<vmem>>, vector<1x8x32xf32>,
    %126 = vector.extract_strided_slice %7 {offsets = [40, 0], sizes = [8, 128], strides = [1, 1]} : vector<64x128xf32> to vector<8x128xf32>
    %cst_28 = arith.constant dense<0.000000e+00> : vector<8x128xf32>
    %127 = tpu.matmul %121, %8, %cst_28 {dimension_numbers = #tpu.dot_dimension_numbers<[1], [0], [0], [1], [0, 0, 1, 1], [], []>} : vector<8x32xf32>, vector<32x128xf32>, vector<8x128xf32> -> vector<8x128xf32>
    %128 = arith.addf %126, %127 : vector<8x128xf32>
    %129 = vector.extract_strided_slice %128 {offsets = [0, 0], sizes = [8, 96], strides = [1, 1]} : vector<8x128xf32> to vector<8x96xf32>
    %130 = arith.negf %129 : vector<8x96xf32>
    %131 = math.exp %130 : vector<8x96xf32>
    %cst_29 = arith.constant 1.000000e+00 : f32
    %132 = vector.broadcast %cst_29 : f32 to vector<8x96xf32>
    %133 = arith.addf %132, %131 : vector<8x96xf32>
    %134 = arith.divf %132, %133 : vector<8x96xf32>
    %135 = vector.extract_strided_slice %128 {offsets = [0, 96], sizes = [8, 32], strides = [1, 1]} : vector<8x128xf32> to vector<8x32xf32>
    %136 = math.tanh %135 : vector<8x32xf32>
    %137 = vector.extract_strided_slice %134 {offsets = [0, 0], sizes = [8, 32], strides = [1, 1]} : vector<8x96xf32> to vector<8x32xf32>
    %138 = vector.extract_strided_slice %134 {offsets = [0, 32], sizes = [8, 32], strides = [1, 1]} : vector<8x96xf32> to vector<8x32xf32>
    %139 = vector.extract_strided_slice %134 {offsets = [0, 64], sizes = [8, 32], strides = [1, 1]} : vector<8x96xf32> to vector<8x32xf32>
    %140 = arith.mulf %138, %119 : vector<8x32xf32>
    %141 = arith.mulf %137, %136 : vector<8x32xf32>
    %142 = arith.addf %140, %141 : vector<8x32xf32>
    %143 = math.tanh %142 : vector<8x32xf32>
    %144 = arith.mulf %139, %143 : vector<8x32xf32>
    %145 = math.tanh %144 : vector<8x32xf32>
    %c5 = arith.constant 5 : index
    %c0_30 = arith.constant 0 : index
    %c0_31 = arith.constant 0 : index
    %146 = vector.load %arg8[%c5, %c0_30, %c0_31] : memref<8x8x32xf32, #tpu.memory_space<vmem>>, vector<1x8x32xf32>
    %147 = vector.shape_cast %146 : vector<1x8x32xf32> to vector<8x32xf32>
    %148 = vector.shape_cast %145 : vector<8x32xf32> to vector<1x8x32xf32>
    tpu.vector_store %arg8[%c5, %c0_30, %c0_31], %148 {strides = array<i32>} : memref<8x8x32xf32, #tpu.memory_space<vmem>>, vector<1x8x32xf32>,
    %149 = vector.extract_strided_slice %7 {offsets = [48, 0], sizes = [8, 128], strides = [1, 1]} : vector<64x128xf32> to vector<8x128xf32>
    %cst_32 = arith.constant dense<0.000000e+00> : vector<8x128xf32>
    %150 = tpu.matmul %144, %8, %cst_32 {dimension_numbers = #tpu.dot_dimension_numbers<[1], [0], [0], [1], [0, 0, 1, 1], [], []>} : vector<8x32xf32>, vector<32x128xf32>, vector<8x128xf32> -> vector<8x128xf32>
    %151 = arith.addf %149, %150 : vector<8x128xf32>
    %152 = vector.extract_strided_slice %151 {offsets = [0, 0], sizes = [8, 96], strides = [1, 1]} : vector<8x128xf32> to vector<8x96xf32>
    %153 = arith.negf %152 : vector<8x96xf32>
    %154 = math.exp %153 : vector<8x96xf32>
    %cst_33 = arith.constant 1.000000e+00 : f32
    %155 = vector.broadcast %cst_33 : f32 to vector<8x96xf32>
    %156 = arith.addf %155, %154 : vector<8x96xf32>
    %157 = arith.divf %155, %156 : vector<8x96xf32>
    %158 = vector.extract_strided_slice %151 {offsets = [0, 96], sizes = [8, 32], strides = [1, 1]} : vector<8x128xf32> to vector<8x32xf32>
    %159 = math.tanh %158 : vector<8x32xf32>
    %160 = vector.extract_strided_slice %157 {offsets = [0, 0], sizes = [8, 32], strides = [1, 1]} : vector<8x96xf32> to vector<8x32xf32>
    %161 = vector.extract_strided_slice %157 {offsets = [0, 32], sizes = [8, 32], strides = [1, 1]} : vector<8x96xf32> to vector<8x32xf32>
    %162 = vector.extract_strided_slice %157 {offsets = [0, 64], sizes = [8, 32], strides = [1, 1]} : vector<8x96xf32> to vector<8x32xf32>
    %163 = arith.mulf %161, %142 : vector<8x32xf32>
    %164 = arith.mulf %160, %159 : vector<8x32xf32>
    %165 = arith.addf %163, %164 : vector<8x32xf32>
    %166 = math.tanh %165 : vector<8x32xf32>
    %167 = arith.mulf %162, %166 : vector<8x32xf32>
    %168 = math.tanh %167 : vector<8x32xf32>
    %c6 = arith.constant 6 : index
    %c0_34 = arith.constant 0 : index
    %c0_35 = arith.constant 0 : index
    %169 = vector.load %arg8[%c6, %c0_34, %c0_35] : memref<8x8x32xf32, #tpu.memory_space<vmem>>, vector<1x8x32xf32>
    %170 = vector.shape_cast %169 : vector<1x8x32xf32> to vector<8x32xf32>
    %171 = vector.shape_cast %168 : vector<8x32xf32> to vector<1x8x32xf32>
    tpu.vector_store %arg8[%c6, %c0_34, %c0_35], %171 {strides = array<i32>} : memref<8x8x32xf32, #tpu.memory_space<vmem>>, vector<1x8x32xf32>,
    %172 = vector.extract_strided_slice %7 {offsets = [56, 0], sizes = [8, 128], strides = [1, 1]} : vector<64x128xf32> to vector<8x128xf32>
    %cst_36 = arith.constant dense<0.000000e+00> : vector<8x128xf32>
    %173 = tpu.matmul %167, %8, %cst_36 {dimension_numbers = #tpu.dot_dimension_numbers<[1], [0], [0], [1], [0, 0, 1, 1], [], []>} : vector<8x32xf32>, vector<32x128xf32>, vector<8x128xf32> -> vector<8x128xf32>
    %174 = arith.addf %172, %173 : vector<8x128xf32>
    %175 = vector.extract_strided_slice %174 {offsets = [0, 0], sizes = [8, 96], strides = [1, 1]} : vector<8x128xf32> to vector<8x96xf32>
    %176 = arith.negf %175 : vector<8x96xf32>
    %177 = math.exp %176 : vector<8x96xf32>
    %cst_37 = arith.constant 1.000000e+00 : f32
    %178 = vector.broadcast %cst_37 : f32 to vector<8x96xf32>
    %179 = arith.addf %178, %177 : vector<8x96xf32>
    %180 = arith.divf %178, %179 : vector<8x96xf32>
    %181 = vector.extract_strided_slice %174 {offsets = [0, 96], sizes = [8, 32], strides = [1, 1]} : vector<8x128xf32> to vector<8x32xf32>
    %182 = math.tanh %181 : vector<8x32xf32>
    %183 = vector.extract_strided_slice %180 {offsets = [0, 0], sizes = [8, 32], strides = [1, 1]} : vector<8x96xf32> to vector<8x32xf32>
    %184 = vector.extract_strided_slice %180 {offsets = [0, 32], sizes = [8, 32], strides = [1, 1]} : vector<8x96xf32> to vector<8x32xf32>
    %185 = vector.extract_strided_slice %180 {offsets = [0, 64], sizes = [8, 32], strides = [1, 1]} : vector<8x96xf32> to vector<8x32xf32>
    %186 = arith.mulf %184, %165 : vector<8x32xf32>
    %187 = arith.mulf %183, %182 : vector<8x32xf32>
    %188 = arith.addf %186, %187 : vector<8x32xf32>
    %189 = math.tanh %188 : vector<8x32xf32>
    %190 = arith.mulf %185, %189 : vector<8x32xf32>
    %191 = math.tanh %190 : vector<8x32xf32>
    %c7 = arith.constant 7 : index
    %c0_38 = arith.constant 0 : index
    %c0_39 = arith.constant 0 : index
    %192 = vector.load %arg8[%c7, %c0_38, %c0_39] : memref<8x8x32xf32, #tpu.memory_space<vmem>>, vector<1x8x32xf32>
    %193 = vector.shape_cast %192 : vector<1x8x32xf32> to vector<8x32xf32>
    %194 = vector.shape_cast %191 : vector<8x32xf32> to vector<1x8x32xf32>
    tpu.vector_store %arg8[%c7, %c0_38, %c0_39], %194 {strides = array<i32>} : memref<8x8x32xf32, #tpu.memory_space<vmem>>, vector<1x8x32xf32>,
    %c0_40 = arith.constant 0 : index
    %c0_41 = arith.constant 0 : index
    %c0_42 = arith.constant 0 : index
    %195 = vector.load %arg8[%c0_40, %c0_41, %c0_42] : memref<8x8x32xf32, #tpu.memory_space<vmem>>, vector<8x8x32xf32>
    %cst_43 = arith.constant 0.000000e+00 : f32
    %196 = vector.broadcast %cst_43 : f32 to vector<8x16xf32>
    %197 = vector.extract_strided_slice %195 {offsets = [0, 0, 0], sizes = [8, 1, 32], strides = [1, 1, 1]} : vector<8x8x32xf32> to vector<8x1x32xf32>
    %198 = vector.shape_cast %197 : vector<8x1x32xf32> to vector<8x32xf32>
    %c0_44 = arith.constant 0 : index
    %c0_45 = arith.constant 0 : index
    %199 = vector.load %arg3[%c0_44, %c0_45] : memref<64x16xf32, #tpu.memory_space<vmem>>, vector<32x16xf32>
    %cst_46 = arith.constant dense<0.000000e+00> : vector<8x16xf32>
    %200 = tpu.matmul %198, %199, %cst_46 {dimension_numbers = #tpu.dot_dimension_numbers<[1], [0], [0], [1], [0, 0, 1, 1], [], []>} : vector<8x32xf32>, vector<32x16xf32>, vector<8x16xf32> -> vector<8x16xf32>
    %201 = arith.addf %196, %200 : vector<8x16xf32>
    %202 = vector.extract_strided_slice %195 {offsets = [0, 1, 0], sizes = [8, 1, 32], strides = [1, 1, 1]} : vector<8x8x32xf32> to vector<8x1x32xf32>
    %203 = vector.shape_cast %202 : vector<8x1x32xf32> to vector<8x32xf32>
    %c32 = arith.constant 32 : index
    %c0_47 = arith.constant 0 : index
    %204 = vector.load %arg3[%c32, %c0_47] : memref<64x16xf32, #tpu.memory_space<vmem>>, vector<32x16xf32>
    %cst_48 = arith.constant dense<0.000000e+00> : vector<8x16xf32>
    %205 = tpu.matmul %203, %204, %cst_48 {dimension_numbers = #tpu.dot_dimension_numbers<[1], [0], [0], [1], [0, 0, 1, 1], [], []>} : vector<8x32xf32>, vector<32x16xf32>, vector<8x16xf32> -> vector<8x16xf32>
    %206 = arith.addf %201, %205 : vector<8x16xf32>
    %c0_49 = arith.constant 0 : index
    %c0_50 = arith.constant 0 : index
    %207 = vector.load %arg4[%c0_49, %c0_50] : memref<1x16xf32, #tpu.memory_space<vmem>>, vector<1x16xf32>
    %208 = vector.broadcast %207 : vector<1x16xf32> to vector<8x16xf32>
    %209 = arith.addf %206, %208 : vector<8x16xf32>
    %cst_51 = arith.constant 0.000000e+00 : f32
    %210 = vector.broadcast %cst_51 : f32 to vector<8x16xf32>
    %211 = arith.maximumf %209, %210 : vector<8x16xf32>
    %c0_52 = arith.constant 0 : index
    %c0_53 = arith.constant 0 : index
    %212 = vector.load %arg5[%c0_52, %c0_53] : memref<16x128xf32, #tpu.memory_space<vmem>>, vector<16x128xf32>
    %cst_54 = arith.constant dense<0.000000e+00> : vector<8x128xf32>
    %213 = tpu.matmul %211, %212, %cst_54 {dimension_numbers = #tpu.dot_dimension_numbers<[1], [0], [0], [1], [0, 0, 1, 1], [], []>} : vector<8x16xf32>, vector<16x128xf32>, vector<8x128xf32> -> vector<8x128xf32>
    %c0_55 = arith.constant 0 : index
    %c0_56 = arith.constant 0 : index
    %214 = vector.load %arg6[%c0_55, %c0_56] : memref<1x128xf32, #tpu.memory_space<vmem>>, vector<1x128xf32>
    %215 = vector.broadcast %214 : vector<1x128xf32> to vector<8x128xf32>
    %216 = arith.addf %213, %215 : vector<8x128xf32>
    %cst_57 = arith.constant dense<0xFF800000> : vector<8xf32>
    %217 = vector.multi_reduction <maximumf>, %216, %cst_57 [1] : vector<8x128xf32> to vector<8xf32>
    %218 = vector.shape_cast %217 : vector<8xf32> to vector<8x1xf32>
    %219 = vector.broadcast %218 : vector<8x1xf32> to vector<8x128xf32>
    %220 = arith.subf %216, %219 : vector<8x128xf32>
    %221 = math.exp %220 : vector<8x128xf32>
    %cst_58 = arith.constant dense<0.000000e+00> : vector<8xf32>
    %222 = vector.multi_reduction <add>, %221, %cst_58 [1] : vector<8x128xf32> to vector<8xf32>
    %223 = vector.shape_cast %222 : vector<8xf32> to vector<8x1xf32>
    %224 = vector.broadcast %223 : vector<8x1xf32> to vector<8x128xf32>
    %225 = arith.divf %221, %224 : vector<8x128xf32>
    %c0_59 = arith.constant 0 : index
    %c0_60 = arith.constant 0 : index
    %226 = vector.load %arg7[%c0_59, %c0_60] : memref<8x128xf32, #tpu.memory_space<vmem>>, vector<8x128xf32>
    tpu.vector_store %arg7[%c0_59, %c0_60], %225 {strides = array<i32>} : memref<8x128xf32, #tpu.memory_space<vmem>>, vector<8x128xf32>,
    return
  }
}

</mosaic_0001>

<bundles_post_ra>
// kernel: tpu_custom_call.1
= control target key start
LH: loop header
LB: loop body
LE: loop exit
PB: predicated region body
PF: predicated region fallthrough
CT: control target
= control target key end

     0   :  { %v1747_v2 = vmov 0   ;;  %v1748_v5 = vmov 0.0   ;;  %s2107_s0 = inlined_call_operand.vmem [shape: s32[64,1], index: 0, kind: input, shape index: {}]   ;;  %s2108_s1 = inlined_call_operand.vmem [shape: f32[32,128], index: 1, kind: input, shape index: {}]   ;;  %s2109_s2 = inlined_call_operand.vmem [shape: f32[32,128], index: 2, kind: input, shape index: {}]   ;;  %s2110_s3 = inlined_call_operand.vmem [shape: f32[64,16], index: 3, kind: input, shape index: {}]   ;;  %s2111_s4 = inlined_call_operand.vmem [shape: f32[1,16], index: 4, kind: input, shape index: {}]   ;;  %s2112_s5 = inlined_call_operand.vmem [shape: f32[16,128], index: 5, kind: input, shape index: {}]   ;;  %s2113_s6 = inlined_call_operand.vmem [shape: f32[1,128], index: 6, kind: input, shape index: {}]   ;;  %s2114_s7 = inlined_call_operand.hbm [shape: f32[8,128], index: 7, kind: output, shape index: {}]  }
   0x1   :  { %v27_v0 = vld [vmem:[%s2107_s0] sm:$0xff]  ;;  %v88_v1 = vld [vmem:[%s2108_s1 + $0x18] sm:$0xff]  ;;  %1639 = vset.pattern.permute.xlu0 %v1747_v2  ;;  %v87_v4 = vld [vmem:[%s2108_s1 + $0x10] sm:$0xff]  ;;  %1516 = vmatprep.subr.mxu1 %v1748_v5 }
   0x2   :  { %1496 = vmatprep.subr.mxu0 %v88_v1  ;;  %v1802_v3 = vld [vmem:[%s2109_s2 + $0x18] sm:$0xff]  ;;  %38 = vperm.xlu0 %1639, %v27_v0   ;;  %v1811_v6 = vld [vmem:[%s2109_s2 + $0x10] sm:$0xff]  ;;  %v28_v7 = vld [vmem:[%s2107_s0 + $0x8] sm:$0xff] }
   0x3   :  { %1497 = vmatpush3.msra.mxu0 %v88_v1  ;;  %1517 = vmatpush3.msra.mxu1 %v1802_v3  ;;  %v86_v8 = vld [vmem:[%s2108_s1 + $0x8] sm:$0xff] }
   0x4   :  { %12 = vsyncpa [#allocation4], 0  ;;  %1498 = vmatprep.subr.mxu0 %v87_v4  ;;  %1518 = vmatprep.subr.mxu1 %v1748_v5  ;;  %v1825_v9 = vld [vmem:[%s2109_s2 + $0x8] sm:$0xff]  ;;  %v85_v10 = vld [vmem:[%s2108_s1] sm:$0xff]  ;;  %vm1749_vm0 = vmmov 0   ;;  %v35_v12 = vlaneseq  ;;  %vm89_vm1 = vcmask 261120  }
   0x5   :  { %1499 = vmatpush3.msra.mxu0 %v87_v4  ;;  %1519 = vmatpush3.msra.mxu1 %v1811_v6  ;;  %v1834_v11 = vld [vmem:[%s2109_s2] sm:$0xff]  ;;  %s1750_s1 = smov 32   ;;  %s1751_s2 = smov 64   ;;  %v29_v47 = vld [vmem:[%s2107_s0 + $0x10] sm:$0xff]  ;;  %v30_v56 = vld [vmem:[%s2107_s0 + $0x18] sm:$0xff]  ;;  %vm1101_vm10 = vcmask 1041409  }
   0x6   :  { %41 = vperm.xlu0 %1639, %v28_v7   ;;  %1500 = vmatprep.subr.mxu0 %v86_v8  ;;  %v1854_v13 = vand.u32 127, %v35_v12  ;;  %v31_v48 = vld [vmem:[%s2107_s0 + $0x20] sm:$0xff]  ;;  %v33_v49 = vld [vmem:[%s2107_s0 + $0x30] sm:$0xff]  ;;  %v32_v57 = vld [vmem:[%s2107_s0 + $0x28] sm:$0xff]  ;;  %vm1104_vm11 = vcmask 1042434   ;;  %vm1107_vm12 = vcmask 1043459  }
   0x7   :  { %1520 = vmatprep.subr.mxu1 %v1748_v5  ;;  %1501 = vmatpush3.msra.mxu0 %v86_v8  ;;  %v34_v58 = vld [vmem:[%s2107_s0 + $0x38] sm:$0xff]  ;;  %vm1110_vm13 = vcmask 1044484   ;;  %vm1113_vm14 = vcmask 1045509   ;;  %vm1116_vm15 = vcmask 1046534  }
   0x8   :  { %1521 = vmatpush3.msra.mxu1 %v1825_v9  ;;  %1502 = vmatprep.subr.mxu0 %v85_v10 }
   0x9   :  { %1522 = vmatprep.subr.mxu1 %v1748_v5  ;;  %1503 = vmatpush3.msra.mxu0 %v85_v10 }
   0xa   :  { %1523 = vmatpush3.msra.mxu1 %v1834_v11  ;;  %1524 = vmatprep.mubr.msk.f32.mxu1 %vm1749_vm0, %v1748_v5 }
   0xb   :  { %1525 = vmatmul.mubr.f32.vlgmr.msra.gmra.mxu1 %v1748_v5  ;;  %1527 = vmatprep.subr.mxu1 %v1748_v5 }
   0xc   :  { %1528 = vmatpush3.msra.mxu1 %v1802_v3  ;;  %1535 = vmatprep.mubr.msk.f32.mxu1 %vm1749_vm0, %v1748_v5 }
   0xd   :  { %1529 = vmatprep.subr.mxu1 %v1748_v5  ;;  %1640 = vset.pattern.permute.xlu1 %v1747_v2 }
   0xe   :  { %1530 = vmatpush3.msra.mxu1 %v1811_v6  ;;  %1538 = vmatprep.subr.mxu0 %v1748_v5 }
   0xf   :  { %1531 = vmatprep.subr.mxu1 %v1748_v5 }
  0x10   :  { %1532 = vmatpush3.msra.mxu1 %v1825_v9 }
  0x11   :  { %1533 = vmatprep.subr.mxu1 %v1748_v5 }
  0x12   :  { %1534 = vmatpush3.msra.mxu1 %v1834_v11 }
  0x13   :  { %1549 = vmatprep.subr.mxu1 %v1748_v5 }
  0x7d   :  { %v39_v14 = vpop.permute.xlu0 %38 }
  0x7e   :  { %vm61_vm2 = vcmp.eq.s32.totalorder %v1854_v13, %v39_v14 }
  0x7f   :  { %v1395_v15 = vsel %vm61_vm2, 1.0, %v1748_v5  ;;  %vm1119_vm2 = vcmask 1047559  }
  0x80   :  { %1504 = vmatprep.mubr.msk.f32.mxu0 %vm89_vm1, %v1395_v15 }
  0x81   :  { %v42_v16 = vpop.permute.xlu0 %41 }
  0x82   :  { %vm62_vm3 = vcmp.eq.s32.totalorder %v1854_v13, %v42_v16 }
  0x83   :  { %v1396_v17 = vsel %vm62_vm3, 1.0, %v1748_v5 }
  0x84   :  { %1505 = vmatmul.mubr.msk.f32.vlgmr.msra.gmra.mxu0 %vm89_vm1, %v1396_v17 }
  0x85   :  { %1539 = vmatpush3.msra.mxu0 %v1802_v3 }
  0x86   :  { %1540 = vmatprep.subr.mxu0 %v1748_v5 }
  0x87   :  { %1541 = vmatpush3.msra.mxu0 %v1811_v6 }
  0x88   :  { %1542 = vmatprep.subr.mxu0 %v1748_v5 }
  0x89   :  { %1543 = vmatpush3.msra.mxu0 %v1825_v9 }
  0x8a   :  { %1544 = vmatprep.subr.mxu0 %v1748_v5 }
  0x8b   :  { %1545 = vmatpush3.msra.mxu0 %v1834_v11 }
  0x8c   :  { %1560 = vmatprep.subr.mxu0 %v1748_v5 }
  0xcb   :  { %v292_v18 = vpop.f32.mrf.mxu1 }
  0xcd   :  { %v1526_v19 = vpop.f32.mrf.mxu1 }
 0x144   :  { %v1506_v20 = vpop.f32.mrf.mxu0 }
 0x146   :  { %v180_v21 = vpop.f32.mrf.mxu0 }
 0x147   :  { %v296_v22 = vadd.f32 %v292_v18, %v180_v21 }
 0x149   :  { %1641 = vtanh.f32 %v296_v22  ;;  %v1411_v24 = vmul.f32 -1.442695, %v296_v22 }
 0x14b   :  { %1643 = vpow2.f32 %v1411_v24 }
 0x156   :  { %v1642_v23 = vpop.eup %1641 }
 0x157   :  { %306 = vrot.lane.b32.xlu1 %v1642_v23, %s1750_s1 }
 0x158   :  { %v1644_v25 = vpop.eup %1643 }
 0x159   :  { %v300_v26 = vadd.f32 1.0, %v1644_v25 }
 0x15b   :  { %1645 = vrcp.f32 %v300_v26 }
 0x168   :  { %v1646_v27 = vpop.eup %1645 }
 0x169   :  { %v304_v30 = vmul.f32 0.0, %v1646_v27 }
 0x1c9   :  { %v307_v28 = vpop.permute.xlu1 %306 }
 0x1ca   :  { %v309_v29 = vmul.f32 %v1646_v27, %v307_v28 }
 0x1cc   :  { %311 = vrot.lane.b32.xlu1 %v309_v29, %s1750_s1 }
 0x23e   :  { %v312_v31 = vpop.permute.xlu1 %311 }
 0x23f   :  { %v314_v32 = vadd.f32 %v312_v31, %v304_v30 }
 0x241   :  { %1647 = vtanh.f32 %v314_v32 }
 0x24e   :  { %v1648_v33 = vpop.eup %1647 }
 0x24f   :  { %317 = vrot.lane.b32.xlu0 %v1648_v33, %s1750_s1 }
 0x2c1   :  { %v318_v34 = vpop.permute.xlu0 %317 }
 0x2c2   :  { %v1873_v35 = vmul.f32 %v1646_v27, %v318_v34 }
 0x2c4   :  { %328 = vrot.lane.b32.xlu1 %v1873_v35, %s1751_s2 }
 0x336   :  { %v329_v36 = vpop.permute.xlu1 %328 }
 0x337   :  { %1536 = vmatmul.mubr.msk.f32.vlgmr.msra.gmra.mxu1 %vm89_vm1, %v329_v36 }
 0x338   :  { %1550 = vmatpush3.msra.mxu1 %v1802_v3  ;;  %1557 = vmatprep.mubr.msk.f32.mxu1 %vm1749_vm0, %v1748_v5 }
 0x339   :  { %1551 = vmatprep.subr.mxu1 %v1748_v5 }
 0x33a   :  { %1552 = vmatpush3.msra.mxu1 %v1811_v6 }
 0x33b   :  { %1553 = vmatprep.subr.mxu1 %v1748_v5 }
 0x33c   :  { %1554 = vmatpush3.msra.mxu1 %v1825_v9 }
 0x33d   :  { %1555 = vmatprep.subr.mxu1 %v1748_v5 }
 0x33e   :  { %1556 = vmatpush3.msra.mxu1 %v1834_v11 }
 0x33f   :  { %1571 = vmatprep.subr.mxu1 %v1748_v5 }
 0x3f7   :  { %v398_v37 = vpop.f32.mrf.mxu1 }
 0x3f8   :  { %v402_v38 = vadd.f32 %v1506_v20, %v398_v37 }
 0x3f9   :  { %v1537_v39 = vpop.f32.mrf.mxu1 }
 0x3fa   :  { %1649 = vtanh.f32 %v402_v38  ;;  %v1413_v41 = vmul.f32 -1.442695, %v402_v38 }
 0x3fc   :  { %1651 = vpow2.f32 %v1413_v41 }
 0x407   :  { %v1650_v40 = vpop.eup %1649 }
 0x408   :  { %412 = vrot.lane.b32.xlu0 %v1650_v40, %s1750_s1 }
 0x409   :  { %v1652_v42 = vpop.eup %1651 }
 0x40a   :  { %v406_v43 = vadd.f32 1.0, %v1652_v42 }
 0x40c   :  { %1653 = vrcp.f32 %v406_v43 }
 0x419   :  { %v1654_v44 = vpop.eup %1653 }
 0x41a   :  { %v410_v50 = vmul.f32 %v1654_v44, %v314_v32 }
 0x47a   :  { %v413_v45 = vpop.permute.xlu0 %412 }
 0x47b   :  { %v415_v46 = vmul.f32 %v1654_v44, %v413_v45 }
 0x47d   :  { %417 = vrot.lane.b32.xlu1 %v415_v46, %s1750_s1 }
 0x481   :  { %44 = vperm.xlu1 %1640, %v29_v47  }
 0x485   :  { %50 = vperm.xlu1 %1640, %v31_v48  }
 0x489   :  { %56 = vperm.xlu1 %1640, %v33_v49  }
 0x4ef   :  { %v418_v51 = vpop.permute.xlu1 %417 }
 0x4f0   :  { %v1899_v52 = vadd.f32 %v418_v51, %v410_v50 }
 0x4f2   :  { %1655 = vtanh.f32 %v1899_v52 }
 0x4fc   :  { %v45_v53 = vpop.permute.xlu1 %44 }
 0x4fd   :  { %vm63_vm4 = vcmp.eq.s32.totalorder %v1854_v13, %v45_v53 }
 0x4fe   :  { %v1397_v54 = vsel %vm63_vm4, 1.0, %v1748_v5 }
 0x4ff   :  { %v1656_v55 = vpop.eup %1655  ;;  %1507 = vmatprep.mubr.msk.f32.mxu0 %vm89_vm1, %v1397_v54 }
 0x500   :  { %423 = vrot.lane.b32.xlu0 %v1656_v55, %s1750_s1  ;;  %v51_v61 = vpop.permute.xlu1 %50 }
 0x501   :  { %vm65_vm5 = vcmp.eq.s32.totalorder %v1854_v13, %v51_v61 }
 0x502   :  { %v1399_v0 = vsel %vm65_vm5, 1.0, %v1748_v5 }
 0x504   :  { %47 = vperm.xlu0 %1639, %v30_v56   ;;  %v57_v62 = vpop.permute.xlu1 %56 }
 0x505   :  { %vm67_vm7 = vcmp.eq.s32.totalorder %v1854_v13, %v57_v62 }
 0x506   :  { %v1401_v4 = vsel %vm67_vm7, 1.0, %v1748_v5 }
 0x508   :  { %53 = vperm.xlu0 %1639, %v32_v57  }
 0x50c   :  { %59 = vperm.xlu0 %1639, %v34_v58  }
 0x572   :  { %v424_v59 = vpop.permute.xlu0 %423 }
 0x573   :  { %v1915_v60 = vmul.f32 %v1654_v44, %v424_v59 }
 0x575   :  { %435 = vrot.lane.b32.xlu1 %v1915_v60, %s1751_s2 }
 0x57f   :  { %v48_v63 = vpop.permute.xlu0 %47 }
 0x580   :  { %vm64_vm6 = vcmp.eq.s32.totalorder %v1854_v13, %v48_v63 }
 0x581   :  { %v1398_v1 = vsel %vm64_vm6, 1.0, %v1748_v5 }
 0x582   :  { %1508 = vmatmul.mubr.msk.f32.gmra.mxu0 %vm89_vm1, %v1398_v1 }
 0x583   :  { %v54_v2 = vpop.permute.xlu0 %53  ;;  %1510 = vmatprep.mubr.msk.f32.mxu0 %vm89_vm1, %v1399_v0 }
 0x584   :  { %vm66_vm8 = vcmp.eq.s32.totalorder %v1854_v13, %v54_v2 }
 0x585   :  { %v1400_v7 = vsel %vm66_vm8, 1.0, %v1748_v5 }
 0x586   :  { %1511 = vmatmul.mubr.msk.f32.gmra.mxu0 %vm89_vm1, %v1400_v7 }
 0x587   :  { %v60_v8 = vpop.permute.xlu0 %59  ;;  %1513 = vmatprep.mubr.msk.f32.mxu0 %vm89_vm1, %v1401_v4 }
 0x588   :  { %vm68_vm9 = vcmp.eq.s32.totalorder %v1854_v13, %v60_v8 }
 0x589   :  { %v1402_v10 = vsel %vm68_vm9, 1.0, %v1748_v5 }
 0x58a   :  { %1514 = vmatmul.mubr.msk.f32.gmra.mxu0 %vm89_vm1, %v1402_v10 }
 0x58b   :  { %1546 = vmatprep.mubr.msk.f32.mxu0 %vm1749_vm0, %v1748_v5 }
 0x5e7   :  { %v436_v12 = vpop.permute.xlu1 %435 }
 0x5e8   :  { %1547 = vmatmul.mubr.msk.f32.vlgmr.msra.gmra.mxu0 %vm89_vm1, %v436_v12 }
 0x5e9   :  { %1561 = vmatpush3.msra.mxu0 %v1802_v3  ;;  %1568 = vmatprep.mubr.msk.f32.mxu0 %vm1749_vm0, %v1748_v5 }
 0x5ea   :  { %1562 = vmatprep.subr.mxu0 %v1748_v5 }
 0x5eb   :  { %1563 = vmatpush3.msra.mxu0 %v1811_v6 }
 0x5ec   :  { %1564 = vmatprep.subr.mxu0 %v1748_v5 }
 0x5ed   :  { %1565 = vmatpush3.msra.mxu0 %v1825_v9 }
 0x5ee   :  { %1566 = vmatprep.subr.mxu0 %v1748_v5 }
 0x5ef   :  { %1567 = vmatpush3.msra.mxu0 %v1834_v11 }
 0x5f0   :  { %1582 = vmatprep.subr.mxu0 %v1748_v5 }
 0x642   :  { %v1509_v13 = vpop.f32.mrf.mxu0 }
 0x644   :  { %v190_v14 = vpop.f32.mrf.mxu0 }
 0x646   :  { %v1947_v15 = vpop.f32.mrf.mxu0 }
 0x648   :  { %v1949_v16 = vpop.f32.mrf.mxu0 }
 0x64a   :  { %v1951_v17 = vpop.f32.mrf.mxu0 }
 0x64c   :  { %v1953_v18 = vpop.f32.mrf.mxu0 }
 0x6a8   :  { %v505_v19 = vpop.f32.mrf.mxu0 }
 0x6a9   :  { %v509_v20 = vadd.f32 %v505_v19, %v190_v14 }
 0x6aa   :  { %v1548_v21 = vpop.f32.mrf.mxu0 }
 0x6ab   :  { %1657 = vtanh.f32 %v509_v20  ;;  %v1415_v23 = vmul.f32 -1.442695, %v509_v20 }
 0x6ad   :  { %1659 = vpow2.f32 %v1415_v23 }
 0x6b8   :  { %v1658_v22 = vpop.eup %1657 }
 0x6b9   :  { %519 = vrot.lane.b32.xlu0 %v1658_v22, %s1750_s1 }
 0x6ba   :  { %v1660_v24 = vpop.eup %1659 }
 0x6bb   :  { %v513_v25 = vadd.f32 1.0, %v1660_v24 }
 0x6bd   :  { %1661 = vrcp.f32 %v513_v25 }
 0x6ca   :  { %v1662_v26 = vpop.eup %1661 }
 0x6cb   :  { %v517_v29 = vmul.f32 %v1662_v26, %v1899_v52 }
 0x72b   :  { %v520_v27 = vpop.permute.xlu0 %519 }
 0x72c   :  { %v522_v28 = vmul.f32 %v1662_v26, %v520_v27 }
 0x72e   :  { %524 = vrot.lane.b32.xlu1 %v522_v28, %s1750_s1 }
 0x7a0   :  { %v525_v30 = vpop.permute.xlu1 %524 }
 0x7a1   :  { %v527_v31 = vadd.f32 %v525_v30, %v517_v29 }
 0x7a3   :  { %1663 = vtanh.f32 %v527_v31 }
 0x7b0   :  { %v1664_v32 = vpop.eup %1663 }
 0x7b1   :  { %530 = vrot.lane.b32.xlu0 %v1664_v32, %s1750_s1 }
 0x823   :  { %v531_v33 = vpop.permute.xlu0 %530 }
 0x824   :  { %v1959_v34 = vmul.f32 %v1662_v26, %v531_v33 }
 0x826   :  { %542 = vrot.lane.b32.xlu1 %v1959_v34, %s1751_s2 }
 0x898   :  { %v543_v36 = vpop.permute.xlu1 %542 }
 0x899   :  { %1558 = vmatmul.mubr.msk.f32.vlgmr.msra.gmra.mxu1 %vm89_vm1, %v543_v36 }
 0x89a   :  { %1572 = vmatpush3.msra.mxu1 %v1802_v3  ;;  %1579 = vmatprep.mubr.msk.f32.mxu1 %vm1749_vm0, %v1748_v5 }
 0x89b   :  { %1573 = vmatprep.subr.mxu1 %v1748_v5 }
 0x89c   :  { %1574 = vmatpush3.msra.mxu1 %v1811_v6 }
 0x89d   :  { %1575 = vmatprep.subr.mxu1 %v1748_v5 }
 0x89e   :  { %1576 = vmatpush3.msra.mxu1 %v1825_v9 }
 0x89f   :  { %1577 = vmatprep.subr.mxu1 %v1748_v5 }
 0x8a0   :  { %1578 = vmatpush3.msra.mxu1 %v1834_v11 }
 0x8a1   :  { %1593 = vmatprep.subr.mxu1 %v1748_v5 }
 0x959   :  { %v612_v37 = vpop.f32.mrf.mxu1 }
 0x95a   :  { %v616_v38 = vadd.f32 %v1509_v13, %v612_v37 }
 0x95b   :  { %v1559_v39 = vpop.f32.mrf.mxu1 }
 0x95c   :  { %1665 = vtanh.f32 %v616_v38  ;;  %v1417_v41 = vmul.f32 -1.442695, %v616_v38 }
 0x95e   :  { %1667 = vpow2.f32 %v1417_v41 }
 0x969   :  { %v1666_v40 = vpop.eup %1665 }
 0x96a   :  { %626 = vrot.lane.b32.xlu0 %v1666_v40, %s1750_s1 }
 0x96b   :  { %v1668_v42 = vpop.eup %1667 }
 0x96c   :  { %v620_v43 = vadd.f32 1.0, %v1668_v42 }
 0x96e   :  { %1669 = vrcp.f32 %v620_v43 }
 0x97b   :  { %v1670_v44 = vpop.eup %1669 }
 0x97c   :  { %v624_v47 = vmul.f32 %v1670_v44, %v527_v31 }
 0x9dc   :  { %v627_v45 = vpop.permute.xlu0 %626 }
 0x9dd   :  { %v629_v46 = vmul.f32 %v1670_v44, %v627_v45 }
 0x9df   :  { %631 = vrot.lane.b32.xlu1 %v629_v46, %s1750_s1 }
 0xa51   :  { %v632_v48 = vpop.permute.xlu1 %631 }
 0xa52   :  { %v634_v49 = vadd.f32 %v632_v48, %v624_v47 }
 0xa54   :  { %1671 = vtanh.f32 %v634_v49 }
 0xa61   :  { %v1672_v50 = vpop.eup %1671 }
 0xa62   :  { %637 = vrot.lane.b32.xlu0 %v1672_v50, %s1750_s1 }
 0xad4   :  { %v638_v51 = vpop.permute.xlu0 %637 }
 0xad5   :  { %v1977_v52 = vmul.f32 %v1670_v44, %v638_v51 }
 0xad7   :  { %649 = vrot.lane.b32.xlu1 %v1977_v52, %s1751_s2 }
 0xb49   :  { %v650_v53 = vpop.permute.xlu1 %649 }
 0xb4a   :  { %1569 = vmatmul.mubr.msk.f32.vlgmr.msra.gmra.mxu0 %vm89_vm1, %v650_v53 }
 0xb4b   :  { %1583 = vmatpush3.msra.mxu0 %v1802_v3  ;;  %1590 = vmatprep.mubr.msk.f32.mxu0 %vm1749_vm0, %v1748_v5 }
 0xb4c   :  { %1584 = vmatprep.subr.mxu0 %v1748_v5 }
 0xb4d   :  { %1585 = vmatpush3.msra.mxu0 %v1811_v6 }
 0xb4e   :  { %1586 = vmatprep.subr.mxu0 %v1748_v5 }
 0xb4f   :  { %1587 = vmatpush3.msra.mxu0 %v1825_v9 }
 0xb50   :  { %1588 = vmatprep.subr.mxu0 %v1748_v5 }
 0xb51   :  { %1589 = vmatpush3.msra.mxu0 %v1834_v11 }
 0xb52   :  { %1604 = vmatprep.subr.mxu0 %v1748_v5 }
 0xc0a   :  { %v719_v54 = vpop.f32.mrf.mxu0 }
 0xc0b   :  { %v723_v55 = vadd.f32 %v719_v54, %v1949_v16 }
 0xc0c   :  { %v1570_v56 = vpop.f32.mrf.mxu0 }
 0xc0d   :  { %1673 = vtanh.f32 %v723_v55  ;;  %v1419_v58 = vmul.f32 -1.442695, %v723_v55 }
 0xc0f   :  { %1675 = vpow2.f32 %v1419_v58 }
 0xc1a   :  { %v1674_v57 = vpop.eup %1673 }
 0xc1b   :  { %733 = vrot.lane.b32.xlu0 %v1674_v57, %s1750_s1 }
 0xc1c   :  { %v1676_v59 = vpop.eup %1675 }
 0xc1d   :  { %v727_v61 = vadd.f32 1.0, %v1676_v59 }
 0xc1f   :  { %1677 = vrcp.f32 %v727_v61 }
 0xc2c   :  { %v1678_v62 = vpop.eup %1677 }
 0xc2d   :  { %v731_v1 = vmul.f32 %v1678_v62, %v634_v49 }
 0xc8d   :  { %v734_v63 = vpop.permute.xlu0 %733 }
 0xc8e   :  { %v736_v0 = vmul.f32 %v1678_v62, %v734_v63 }
 0xc90   :  { %738 = vrot.lane.b32.xlu1 %v736_v0, %s1750_s1 }
 0xd02   :  { %v739_v2 = vpop.permute.xlu1 %738 }
 0xd03   :  { %v741_v4 = vadd.f32 %v739_v2, %v731_v1 }
 0xd05   :  { %1679 = vtanh.f32 %v741_v4 }
 0xd12   :  { %v1680_v7 = vpop.eup %1679 }
 0xd13   :  { %744 = vrot.lane.b32.xlu0 %v1680_v7, %s1750_s1 }
 0xd85   :  { %v745_v8 = vpop.permute.xlu0 %744 }
 0xd86   :  { %v1996_v10 = vmul.f32 %v1678_v62, %v745_v8 }
 0xd88   :  { %756 = vrot.lane.b32.xlu1 %v1996_v10, %s1751_s2 }
 0xdfa   :  { %v757_v12 = vpop.permute.xlu1 %756 }
 0xdfb   :  { %1580 = vmatmul.mubr.msk.f32.vlgmr.msra.gmra.mxu1 %vm89_vm1, %v757_v12  ;;  %v1091_v12 = vld [vmem:[%s2110_s3 + $0x38] sm:$0xff] }
 0xdfc   :  { %1594 = vmatpush3.msra.mxu1 %v1802_v3  ;;  %1601 = vmatprep.mubr.msk.f32.mxu1 %vm1749_vm0, %v1748_v5 }
 0xdfd   :  { %1595 = vmatprep.subr.mxu1 %v1748_v5 }
 0xdfe   :  { %1596 = vmatpush3.msra.mxu1 %v1811_v6 }
 0xdff   :  { %1597 = vmatprep.subr.mxu1 %v1748_v5 }
 0xe00   :  { %1598 = vmatpush3.msra.mxu1 %v1825_v9 }
 0xe01   :  { %1599 = vmatprep.subr.mxu1 %v1748_v5 }
 0xe02   :  { %1600 = vmatpush3.msra.mxu1 %v1834_v11 }
 0xe03   :  { %1615 = vmatprep.subr.mxu1 %v1748_v5 }
 0xebb   :  { %v826_v13 = vpop.f32.mrf.mxu1 }
 0xebc   :  { %v830_v3 = vadd.f32 %v1947_v15, %v826_v13  ;;  %v1087_v13 = vld [vmem:[%s2110_s3 + $0x18] sm:$0xff] }
 0xebd   :  { %v1581_v14 = vpop.f32.mrf.mxu1 }
 0xebe   :  { %1681 = vtanh.f32 %v830_v3  ;;  %v1421_v19 = vmul.f32 -1.442695, %v830_v3  ;;  %v1090_v3 = vld [vmem:[%s2110_s3 + $0x30] sm:$0xff] }
 0xebf   :  { %v1086_v14 = vld [vmem:[%s2110_s3 + $0x10] sm:$0xff] }
 0xec0   :  { %1683 = vpow2.f32 %v1421_v19  ;;  %v1085_v19 = vld [vmem:[%s2110_s3 + $0x8] sm:$0xff] }
 0xecb   :  { %v1682_v16 = vpop.eup %1681 }
 0xecc   :  { %840 = vrot.lane.b32.xlu0 %v1682_v16, %s1750_s1  ;;  %v1089_v16 = vld [vmem:[%s2110_s3 + $0x28] sm:$0xff] }
 0xecd   :  { %v1684_v6 = vpop.eup %1683 }
 0xece   :  { %v834_v20 = vadd.f32 1.0, %v1684_v6 }
 0xed0   :  { %1685 = vrcp.f32 %v834_v20  ;;  %v1088_v20 = vld [vmem:[%s2110_s3 + $0x20] sm:$0xff] }
 0xedd   :  { %v1686_v9 = vpop.eup %1685 }
 0xede   :  { %v838_v11 = vmul.f32 %v1686_v9, %v741_v4 }
 0xf3e   :  { %v841_v21 = vpop.permute.xlu0 %840 }
 0xf3f   :  { %v843_v22 = vmul.f32 %v1686_v9, %v841_v21 }
 0xf41   :  { %845 = vrot.lane.b32.xlu1 %v843_v22, %s1750_s1 }
 0xfb3   :  { %v846_v23 = vpop.permute.xlu1 %845 }
 0xfb4   :  { %v848_v24 = vadd.f32 %v846_v23, %v838_v11 }
 0xfb6   :  { %1687 = vtanh.f32 %v848_v24 }
 0xfc3   :  { %v1688_v15 = vpop.eup %1687 }
 0xfc4   :  { %851 = vrot.lane.b32.xlu0 %v1688_v15, %s1750_s1 }
0x1036   :  { %v852_v25 = vpop.permute.xlu0 %851 }
0x1037   :  { %v2015_v26 = vmul.f32 %v1686_v9, %v852_v25  ;;  %v1084_v9 = vld [vmem:[%s2110_s3] sm:$0xff] }
0x1039   :  { %863 = vrot.lane.b32.xlu1 %v2015_v26, %s1751_s2 }
0x10ab   :  { %v864_v27 = vpop.permute.xlu1 %863 }
0x10ac   :  { %1591 = vmatmul.mubr.msk.f32.vlgmr.msra.gmra.mxu0 %vm89_vm1, %v864_v27 }
0x10ad   :  { %1612 = vmatprep.mubr.msk.f32.mxu0 %vm1749_vm0, %v1748_v5  ;;  %1605 = vmatpush3.msra.mxu0 %v1091_v12 }
0x10ae   :  { %1606 = vmatprep.subr.mxu0 %v1748_v5 }
0x10af   :  { %1607 = vmatpush3.msra.mxu0 %v1090_v3 }
0x10b0   :  { %1608 = vmatprep.subr.mxu0 %v1748_v5 }
0x10b1   :  { %1609 = vmatpush3.msra.mxu0 %v1089_v16 }
0x10b2   :  { %1610 = vmatprep.subr.mxu0 %v1748_v5 }
0x10b3   :  { %1611 = vmatpush3.msra.mxu0 %v1088_v20 }
0x10b4   :  { %1626 = vmatprep.subr.mxu0 %v1748_v5 }
0x116c   :  { %v933_v28 = vpop.f32.mrf.mxu0 }
0x116d   :  { %v937_v29 = vadd.f32 %v933_v28, %v1953_v18 }
0x116e   :  { %v1592_v30 = vpop.f32.mrf.mxu0 }
0x116f   :  { %1689 = vtanh.f32 %v937_v29  ;;  %v1423_v32 = vmul.f32 -1.442695, %v937_v29 }
0x1171   :  { %1691 = vpow2.f32 %v1423_v32 }
0x117c   :  { %v1690_v31 = vpop.eup %1689 }
0x117d   :  { %947 = vrot.lane.b32.xlu0 %v1690_v31, %s1750_s1 }
0x117e   :  { %v1692_v33 = vpop.eup %1691 }
0x117f   :  { %v941_v36 = vadd.f32 1.0, %v1692_v33 }
0x1181   :  { %1693 = vrcp.f32 %v941_v36 }
0x118e   :  { %v1694_v37 = vpop.eup %1693 }
0x118f   :  { %v945_v40 = vmul.f32 %v1694_v37, %v848_v24 }
0x11ef   :  { %v948_v38 = vpop.permute.xlu0 %947 }
0x11f0   :  { %v950_v39 = vmul.f32 %v1694_v37, %v948_v38 }
0x11f2   :  { %952 = vrot.lane.b32.xlu1 %v950_v39, %s1750_s1 }
0x1264   :  { %v953_v41 = vpop.permute.xlu1 %952 }
0x1265   :  { %v955_v42 = vadd.f32 %v953_v41, %v945_v40 }
0x1267   :  { %1695 = vtanh.f32 %v955_v42 }
0x1274   :  { %v1696_v18 = vpop.eup %1695 }
0x1275   :  { %958 = vrot.lane.b32.xlu0 %v1696_v18, %s1750_s1 }
0x12e7   :  { %v959_v43 = vpop.permute.xlu0 %958 }
0x12e8   :  { %v961_v44 = vmul.f32 %v1694_v37, %v959_v43 }
0x12ea   :  { %970 = vrot.lane.b32.xlu1 %v961_v44, %s1751_s2 }
0x135c   :  { %v971_v45 = vpop.permute.xlu1 %970 }
0x135d   :  { %1602 = vmatmul.mubr.msk.f32.vlgmr.msra.gmra.mxu1 %vm89_vm1, %v971_v45 }
0x135e   :  { %1623 = vmatprep.mubr.msk.f32.mxu1 %vm1749_vm0, %v1748_v5  ;;  %1616 = vmatpush3.msra.mxu1 %v1087_v13 }
0x135f   :  { %1617 = vmatprep.subr.mxu1 %v1748_v5 }
0x1360   :  { %1618 = vmatpush3.msra.mxu1 %v1086_v14 }
0x1361   :  { %1619 = vmatprep.subr.mxu1 %v1748_v5 }
0x1362   :  { %1620 = vmatpush3.msra.mxu1 %v1085_v19 }
0x1363   :  { %1621 = vmatprep.subr.mxu1 %v1748_v5 }
0x1364   :  { %1622 = vmatpush3.msra.mxu1 %v1084_v9 }
0x141d   :  { %v1040_v46 = vpop.f32.mrf.mxu1 }
0x141e   :  { %v1044_v47 = vadd.f32 %v1951_v17, %v1040_v46 }
0x141f   :  { %v1603_v48 = vpop.f32.mrf.mxu1 }
0x1420   :  { %1697 = vtanh.f32 %v1044_v47  ;;  %v1425_v50 = vmul.f32 -1.442695, %v1044_v47 }
0x1422   :  { %1699 = vpow2.f32 %v1425_v50 }
0x142d   :  { %v1698_v49 = vpop.eup %1697 }
0x142e   :  { %1054 = vrot.lane.b32.xlu0 %v1698_v49, %s1750_s1 }
0x142f   :  { %v1700_v51 = vpop.eup %1699 }
0x1430   :  { %v1048_v53 = vadd.f32 1.0, %v1700_v51 }
0x1432   :  { %1701 = vrcp.f32 %v1048_v53 }
0x1433   :  { %1703 = vtanh.f32 %v1873_v35 }
0x1434   :  { %1705 = vtanh.f32 %v1959_v34 }
0x1435   :  { %1707 = vtanh.f32 %v1996_v10 }
0x1436   :  { %1709 = vtanh.f32 %v961_v44 }
0x143f   :  { %v1702_v54 = vpop.eup %1701 }
0x1440   :  { %v1704_v17 = vpop.eup %1703  ;;  %v1052_v34 = vmul.f32 %v1702_v54, %v955_v42 }
0x1441   :  { %v1706_v57 = vpop.eup %1705 }
0x1442   :  { %v1708_v58 = vpop.eup %1707 }
0x1443   :  { %v1710_v35 = vpop.eup %1709 }
0x14a0   :  { %v1055_v55 = vpop.permute.xlu0 %1054 }
0x14a1   :  { %v1057_v56 = vmul.f32 %v1702_v54, %v1055_v55 }
0x14a3   :  { %1059 = vrot.lane.b32.xlu1 %v1057_v56, %s1750_s1 }
0x14a7   :  { %323 = vrot.lane.b32.xlu1 %v1704_v17, %s1751_s2 }
0x14ab   :  { %536 = vrot.lane.b32.xlu1 %v1706_v57, %s1751_s2 }
0x14af   :  { %750 = vrot.lane.b32.xlu1 %v1708_v58, %s1751_s2 }
0x14b3   :  { %964 = vrot.lane.b32.xlu1 %v1710_v35, %s1751_s2  ;;  %v1289_v35 = vld [vmem:[%s2112_s5 + $0x8] sm:$0xff] }
0x1515   :  { %v1060_v59 = vpop.permute.xlu1 %1059 }
0x1516   :  { %v1062_v61 = vadd.f32 %v1060_v59, %v1052_v34  ;;  %v1288_v34 = vld [vmem:[%s2112_s5] sm:$0xff] }
0x1518   :  { %1711 = vtanh.f32 %v1062_v61 }
0x1519   :  { %v324_v62 = vpop.permute.xlu1 %323  ;;  %1713 = vtanh.f32 %v1915_v60 }
0x151a   :  { %326 = vst.msk [vmem:[#allocation2] sm:$0xff] %vm89_vm1, %v324_v62  ;;  %1715 = vtanh.f32 %v1977_v52  ;;  %v1428_v62 = vld [vmem:[%s2111_s4] ss:$0 sm:$0xff]  ;;  %s1752_s4 = smov [#allocation3]  }
0x151b   :  { %1717 = vtanh.f32 %v2015_v26  ;;  %s1387_s5 = sshll.u32 %s1752_s4, 4  ;;  %s1388_s5 = int_to_ptr.vmem [resolvable:$true] %s1387_s5 }
0x151c   :  { %s1725_s30 = scalar_lea.vmem %s1388_s5, 128  ;;  %p1730_p1 = scmp.lt.s32.totalorder %s1388_s5, %s1388_s5 }
0x151d   :  { %v537_v63 = vpop.permute.xlu1 %536  ;;  %p1726_p0 = scmp.ne.s32.totalorder %s1388_s5, %s1725_s30  ;;  %p1731_p2 = scmp.lt.s32.totalorder %s1725_s30, %s1725_s30 }
0x151e   :  { %540 = vst.msk [vmem:[#allocation2 + $0x10] sm:$0xff] %vm89_vm1, %v537_v63 }
0x151f   :  { %p1732_p3 = por %p1731_p2, %p1730_p1 }
0x1521   :  { %v751_v0 = vpop.permute.xlu1 %750  ;;  %v1076_v23 = vld [vmem:[#allocation2] sm:$0xff]  ;;  %p1733_p4 = pnand %p1732_p3, %p1726_p0 }
0x1522   :  { %754 = vst.msk [vmem:[#allocation2 + $0x20] sm:$0xff] %vm89_vm1, %v751_v0  ;;  %v1100_v26 = vrot.slane %v1076_v23, 1 }
0x1525   :  { %v1712_v1 = vpop.eup %1711  ;;  %v965_v2 = vpop.permute.xlu1 %964  ;;  %v1078_v25 = vld [vmem:[#allocation2 + $0x10] sm:$0xff] }
0x1526   :  { %968 = vst.msk [vmem:[#allocation2 + $0x30] sm:$0xff] %vm89_vm1, %v965_v2  ;;  %1065 = vrot.lane.b32.xlu0 %v1712_v1, %s1750_s1  ;;  %v1714_v4 = vpop.eup %1713  ;;  %v1103_v33 = vrot.slane %v1078_v25, 7  ;;  %v1195_v36 = vrot.slane %v1078_v25, 6 }
0x1527   :  { %v1716_v60 = vpop.eup %1715 }
0x1528   :  { %v1718_v7 = vpop.eup %1717 }
0x1529   :  { %v1080_v37 = vld [vmem:[#allocation2 + $0x20] sm:$0xff] }
0x152a   :  { %429 = vrot.lane.b32.xlu0 %v1714_v4, %s1751_s2  ;;  %v1109_v43 = vrot.slane %v1080_v37, 5  ;;  %v1199_v44 = vrot.slane %v1080_v37, 4 }
0x152d   :  { %v1082_v45 = vld [vmem:[#allocation2 + $0x30] sm:$0xff] }
0x152e   :  { %643 = vrot.lane.b32.xlu0 %v1716_v60, %s1751_s2  ;;  %v1115_v51 = vrot.slane %v1082_v45, 3  ;;  %v1203_v53 = vrot.slane %v1082_v45, 2 }
0x1532   :  { %857 = vrot.lane.b32.xlu0 %v1718_v7, %s1751_s2 }
0x1598   :  { %v1066_v52 = vpop.permute.xlu0 %1065 }
0x1599   :  { %v1068_v8 = vmul.f32 %v1702_v54, %v1066_v52 }
0x159b   :  { %1719 = vtanh.f32 %v1068_v8 }
0x159c   :  { %v430_v10 = vpop.permute.xlu0 %429 }
0x159d   :  { %433 = vst.msk [vmem:[#allocation2 + $0x8] sm:$0xff] %vm89_vm1, %v430_v10 }
0x15a0   :  { %v644_v6 = vpop.permute.xlu0 %643 }
0x15a1   :  { %647 = vst.msk [vmem:[#allocation2 + $0x18] sm:$0xff] %vm89_vm1, %v644_v6 }
0x15a4   :  { %v858_v21 = vpop.permute.xlu0 %857  ;;  %v1077_v11 = vld [vmem:[#allocation2 + $0x8] sm:$0xff] }
0x15a5   :  { %861 = vst.msk [vmem:[#allocation2 + $0x28] sm:$0xff] %vm89_vm1, %v858_v21  ;;  %v1193_v24 = vrot.slane %v1077_v11, 7  ;;  %v1102_v27 = vsel %vm1101_vm10, %v1077_v11, %v1100_v26 }
0x15a6   :  { %v1105_v38 = vsel %vm1104_vm11, %v1103_v33, %v1102_v27 }
0x15a7   :  { %v1194_v29 = vsel %vm1101_vm10, %v1193_v24, %v1076_v23 }
0x15a8   :  { %v1720_v22 = vpop.eup %1719  ;;  %v1079_v15 = vld [vmem:[#allocation2 + $0x18] sm:$0xff]  ;;  %v1196_v39 = vsel %vm1104_vm11, %v1195_v36, %v1194_v29 }
0x15a9   :  { %1071 = vrot.lane.b32.xlu0 %v1720_v22, %s1751_s2  ;;  %v1106_v28 = vrot.slane %v1079_v15, 6  ;;  %v1197_v30 = vrot.slane %v1079_v15, 5 }
0x15ab   :  { %v1108_v40 = vsel %vm1107_vm12, %v1106_v28, %v1105_v38  ;;  %v1198_v42 = vsel %vm1107_vm12, %v1197_v30, %v1196_v39 }
0x15ac   :  { %v1081_v32 = vld [vmem:[#allocation2 + $0x28] sm:$0xff]  ;;  %v1111_v46 = vsel %vm1110_vm13, %v1109_v43, %v1108_v40  ;;  %v1200_v47 = vsel %vm1110_vm13, %v1199_v44, %v1198_v42 }
0x15ad   :  { %v1112_v41 = vrot.slane %v1081_v32, 4  ;;  %v1201_v18 = vrot.slane %v1081_v32, 3 }
0x15af   :  { %v1114_v48 = vsel %vm1113_vm14, %v1112_v41, %v1111_v46  ;;  %v1202_v49 = vsel %vm1113_vm14, %v1201_v18, %v1200_v47 }
0x15b0   :  { %v1117_v56 = vsel %vm1116_vm15, %v1115_v51, %v1114_v48  ;;  %v1204_v17 = vsel %vm1116_vm15, %v1203_v53, %v1202_v49 }
0x161b   :  { %v1072_v31 = vpop.permute.xlu0 %1071 }
0x161c   :  { %1075 = vst.msk [vmem:[#allocation2 + $0x38] sm:$0xff] %vm89_vm1, %v1072_v31 }
0x1623   :  { %v1083_v50 = vld [vmem:[#allocation2 + $0x38] sm:$0xff] }
0x1624   :  { %v1118_v54 = vrot.slane %v1083_v50, 2  ;;  %v1205_v55 = vrot.slane %v1083_v50, 1 }
0x1626   :  { %v1120_v57 = vsel %vm1119_vm2, %v1118_v54, %v1117_v56  ;;  %v1206_v58 = vsel %vm1119_vm2, %v1205_v55, %v1204_v17 }
0x1627   :  { %1613 = vmatmul.mubr.msk.f32.vlgmr.msra.gmra.mxu0 %vm89_vm1, %v1120_v57  ;;  %1624 = vmatmul.mubr.msk.f32.vlgmr.msra.gmra.mxu1 %vm89_vm1, %v1206_v58 }
0x1628   :  { %1630 = vmatprep.mubr.msk.f32.mxu0 %vm1749_vm0, %v1748_v5  ;;  %1627 = vmatpush3.msra.mxu0 %v1289_v35  ;;  %vm1297_vm0 = vcmask 130048  }
0x1629   :  { %1628 = vmatprep.subr.mxu0 %v1748_v5  ;;  %v1429_v5 = vld [vmem:[%s2113_s6] ss:$0 sm:$0xff] }
0x162a   :  { %1629 = vmatpush3.msra.mxu0 %v1288_v34 }
0x16e7   :  { %v1189_v59 = vpop.f32.mrf.mxu0  ;;  %v1275_v61 = vpop.f32.mrf.mxu1 }
0x16e8   :  { %v1276_v63 = vadd.f32 %v1275_v61, %v1189_v59 }
0x16e9   :  { %v1614_v0 = vpop.f32.mrf.mxu0  ;;  %v1625_v1 = vpop.f32.mrf.mxu1 }
0x16ea   :  { %v1286_v2 = vadd.f32 %v1428_v62, %v1276_v63 }
0x16ec   :  { %v1287_v4 = vmax.f32 %v1286_v2, 0.0 }
0x16ee   :  { %1631 = vmatmul.mubr.msk.f32.vlgmr.msra.gmra.mxu0 %vm1297_vm0, %v1287_v4 }
0x17ae   :  { %v1367_v60 = vpop.f32.mrf.mxu0 }
0x17af   :  { %v1368_v7 = vadd.f32 %v1429_v5, %v1367_v60 }
0x17b0   :  { %v1632_v52 = vpop.f32.mrf.mxu0 }
0x17b1   :  { %1371 = vmax.xlane.f32.xlu1 %v1368_v7 }
0x183a   :  { %v1372_v8 = vpop.xlane.xlu1 %1371 }
0x183b   :  { %v1373_v10 = vsub.f32 %v1368_v7, %v1372_v8 }
0x183d   :  { %v1374_v12 = vmul.f32 1.442695, %v1373_v10 }
0x183f   :  { %1721 = vpow2.f32 %v1374_v12 }
0x184c   :  { %v1722_v13 = vpop.eup %1721 }
0x184d   :  { %1376 = vadd.xlane.f32.xlu0 %v1722_v13 }
0x18d6   :  { %v1377_v3 = vpop.xlane.xlu0 %1376 }
0x18d7   :  { %1723 = vrcp.f32 %v1377_v3 }
0x18e4   :  { %v1724_v14 = vpop.eup %1723 }
0x18e5   :  { %v1379_v16 = vmul.f32 %v1724_v14, %v1722_v13 }
0x18e7   :  { %1380 = vst [vmem:[#allocation3] sm:$0xff] %v1379_v16 }
0x18e8   :  { %1736 = shalt.err (!%p1733_p4)
}
0x18e9   :  { %1390 = dma.vmem_to_hbm [thread:$0]  %s1388_s5, 128, %s2114_s7, [#allocation4]  }
0x18ea   :  { %1745 = dma.done.wait [#allocation4], 128  }
0x18eb   :  { %1746 = vsyncadd [#allocation4], 4294967168 }
0x18ec   :  { %1394 = vsyncpa [#allocation4], 1 }

</bundles_post_ra>
